<compile_context>
chip_gen: v6e
topology: v6e:2x2x1
jax: 0.10.0
libtpu: 0.0.40
codegen_flags: <defaults>
</compile_context>

<pallas_src>
import functools

import jax
import jax.numpy as jnp
from jax import lax
from jax.experimental import pallas as pl
from jax.experimental.pallas import tpu as pltpu


def _ls_ce_kernel(pred_ref, gt_ref, loss_ref, correct_ref, *,
                  smoothing: float, n_total: int, tile_n: int):
    confidence = 1.0 - smoothing

    x = pred_ref[...].astype(jnp.float32)            # (TB, C, TN)
    gt = gt_ref[...]                                 # (TB, 1, TN) int32
    tb, c, tn = x.shape

    # log-softmax pieces over the class (sublane) axis.
    m = jnp.max(x, axis=1, keepdims=True)            # (TB, 1, TN)
    shifted = x - m                                  # (TB, C, TN)
    lse = jnp.log(jnp.sum(jnp.exp(shifted), axis=1, keepdims=True))  # (TB, 1, TN)

    cls_idx = lax.broadcasted_iota(jnp.int32, (tb, c, tn), 1)

    # -logp[gt] = lse - shifted[gt]; no logprobs tensor / f32 one-hot needed.
    shifted_gt = jnp.sum(jnp.where(cls_idx == gt, shifted, 0.0),
                         axis=1, keepdims=True)                        # (TB, 1, TN)
    loss_pos = lse - shifted_gt                                        # -logp[gt]
    loss_smooth = lse - jnp.sum(shifted, axis=1, keepdims=True) / c    # -mean(logp)
    loss = confidence * loss_pos + smoothing * loss_smooth             # (TB, 1, TN)

    # argmax over classes (first index of the max -> matches reference tie-break).
    pred_idx = jnp.min(jnp.where(x == m, cls_idx, jnp.int32(c)),
                       axis=1, keepdims=True)                          # (TB, 1, TN)
    correct = (pred_idx == gt).astype(jnp.float32)                     # (TB, 1, TN)

    # Lane-tail mask: only the lane (N) axis can have a padded tail (TB | B).
    # Use jnp.where (select), not multiply: padded lanes may contain NaN/Inf.
    lane = lax.broadcasted_iota(jnp.int32, (tb, 1, tn), 2)
    valid = (pl.program_id(1) * tile_n + lane) < n_total
    loss = jnp.where(valid, loss, 0.0)
    correct = jnp.where(valid, correct, 0.0)

    # Per-tile partial sums -> tiny (1, 1, 1) output blocks (sum lanes, then batch rows).
    loss_sum = jnp.sum(jnp.sum(loss, axis=2, keepdims=True), axis=0, keepdims=True)
    corr_sum = jnp.sum(jnp.sum(correct, axis=2, keepdims=True), axis=0, keepdims=True)
    loss_ref[...] = loss_sum
    correct_ref[...] = corr_sum


def _vmem_capacity_bytes() -> int:
    try:
        cap = int(pltpu.get_tpu_info().vmem_capacity_bytes)
        if cap > 0:
            return cap
    except Exception:
        pass
    return 64 * 1024 * 1024  # conservative fallback: v7x per-TC VMEM


def _choose_tiles(B: int, C: int, N: int, itemsize: int, vmem_cap: int):
    """Pick (TB, TN) so every grid step moves a multi-MiB pred block while the
    double-buffered block + live f32 temporaries stay within ~40% of VMEM."""
    # Per (batch-row, point): double-buffered pred (2*itemsize*C) + ~5 live
    # (C,)-wide f32/int32 temporaries (20*C) + a few (1,)-wide per-point temps.
    bytes_per_pt = C * (2 * itemsize + 20) + 32
    budget = max(int(0.40 * vmem_cap), 8 * 1024 * 1024)
    pts = max(budget // bytes_per_pt, 128)          # points per grid step

    n_pad = ((N + 127) // 128) * 128
    if n_pad <= pts:
        # Whole N fits in one lane tile; add batch rows (TB must divide B) to
        # keep amortizing the per-step overhead on short-N / small-C shapes.
        rows = max(pts // n_pad, 1)
        tb = 1
        for d in range(1, B + 1):
            if B % d == 0 and d <= rows:
                tb = d
        return tb, N                                # block == full dim is allowed
    tn = max(min((pts // 128) * 128, n_pad), 128)   # multiple of 128; padded tail masked
    return 1, tn


def label_smoothing_ce(pred, gt, smoothing: float = 0.1, *,
                       tile_n: int | None = None, tile_b: int | None = None):
    """pred: (B, C, N) float (f32/bf16); gt: (B, N) int in [0, C).  -> (loss, acc)."""
    B, C, N = pred.shape
    gt3 = gt.reshape(B, 1, N).astype(jnp.int32)     # metadata-only reshape

    vmem_cap = _vmem_capacity_bytes()
    auto_tb, auto_tn = _choose_tiles(B, C, N, jnp.dtype(pred.dtype).itemsize, vmem_cap)
    tb = auto_tb if tile_b is None else int(tile_b)
    tn = auto_tn if tile_n is None else int(tile_n)
    if B % tb != 0:
        tb = 1                                      # TB must divide B (no batch tail)
    if tn != N and tn % 128 != 0:
        tn = max((tn // 128) * 128, 128)            # lane blocks must be 128-multiples
    nb = B // tb
    nt = pl.cdiv(N, tn)

    kernel = functools.partial(_ls_ce_kernel, smoothing=float(smoothing),
                               n_total=N, tile_n=tn)

    M = B * N
    pred_bytes = pred.size * jnp.dtype(pred.dtype).itemsize
    cost = pl.CostEstimate(
        flops=10 * M * C,
        transcendentals=M * (C + 1),
        bytes_accessed=pred_bytes + gt3.size * 4 + 2 * nb * nt * 4,
    )

    loss_part, correct_part = pl.pallas_call(
        kernel,
        out_shape=(
            jax.ShapeDtypeStruct((nb * nt, 1, 1), jnp.float32),
            jax.ShapeDtypeStruct((nb * nt, 1, 1), jnp.float32),
        ),
        grid_spec=pltpu.PrefetchScalarGridSpec(
            num_scalar_prefetch=0,
            grid=(nb, nt),
            in_specs=[
                pl.BlockSpec((tb, C, tn), lambda b, j: (b, 0, j)),
                pl.BlockSpec((tb, 1, tn), lambda b, j: (b, 0, j)),
            ],
            out_specs=(
                pl.BlockSpec((1, 1, 1), lambda b, j: (b * nt + j, 0, 0)),
                pl.BlockSpec((1, 1, 1), lambda b, j: (b * nt + j, 0, 0)),
            ),
        ),
        compiler_params=pltpu.CompilerParams(
            # No cross-step state: both axes independent.  (On v7x, a leading
            # CORE_PARALLEL axis could shard the grid across the 2 TCs if
            # profiling shows one TC idle.)
            dimension_semantics=("parallel", "parallel"),
            vmem_limit_bytes=int(min(0.85 * vmem_cap, 120 * 1024 * 1024)),
        ),
        cost_estimate=cost,
    )(pred, gt3)

    denom = jnp.float32(B * N)
    loss = jnp.sum(loss_part) / denom
    acc = jnp.sum(correct_part) / denom
    # TODO(synk): torch returns acc via .item() (host sync); here acc stays a JAX scalar.
    return loss, acc


def _reference(pred, gt, smoothing=0.1):
    B, C, N = pred.shape
    p = jnp.transpose(pred, (0, 2, 1)).reshape(B * N, C).astype(jnp.float32)
    g = gt.reshape(B * N)
    acc = jnp.mean((jnp.argmax(p, axis=-1) == g).astype(jnp.float32))
    logprobs = jax.nn.log_softmax(p, axis=-1)
    loss_pos = -jnp.take_along_axis(logprobs, g[:, None], axis=-1)[:, 0]
    loss_smooth = -jnp.mean(logprobs, axis=-1)
    loss = (1.0 - smoothing) * loss_pos + smoothing * loss_smooth
    return jnp.mean(loss), acc


if __name__ == "__main__":
    key = jax.random.PRNGKey(0)
    k1, k2, k3, k4 = jax.random.split(key, 4)

    # Case 1: tiny shapes matching the module (pred: (B, num_class, N)), auto tiles.
    B, C, N = 2, 4, 16
    pred = jax.random.normal(k1, (B, C, N), dtype=jnp.float32)
    gt = jax.random.randint(k2, (B, N), 0, C, dtype=jnp.int32)

    loss, acc = label_smoothing_ce(pred, gt, smoothing=0.1)
    loss, acc = jax.block_until_ready((loss, acc))
    ref_loss, ref_acc = _reference(pred, gt, smoothing=0.1)
    assert abs(float(loss) - float(ref_loss)) < 1e-4, (loss, ref_loss)
    assert abs(float(acc) - float(ref_acc)) < 1e-6, (acc, ref_acc)

    # Case 2: exercise both grid axes, the lane-tail mask, and partial-sum outputs.
    B2, C2, N2 = 2, 4, 200
    pred2 = jax.random.normal(k3, (B2, C2, N2), dtype=jnp.float32)
    gt2 = jax.random.randint(k4, (B2, N2), 0, C2, dtype=jnp.int32)

    loss2, acc2 = label_smoothing_ce(pred2, gt2, smoothing=0.1, tile_n=128, tile_b=1)
    loss2, acc2 = jax.block_until_ready((loss2, acc2))
    ref_loss2, ref_acc2 = _reference(pred2, gt2, smoothing=0.1)
    assert abs(float(loss2) - float(ref_loss2)) < 1e-4, (loss2, ref_loss2)
    assert abs(float(acc2) - float(ref_acc2)) < 1e-6, (acc2, ref_acc2)

    print("KERNEL_OK")
</pallas_src>

<mosaic_0001>
module attributes {stable_mosaic.version = 11 : i64} {
  func.func @_ls_ce_kernel(%arg0: i32, %arg1: i32, %arg2: memref<2x4x16xf32, #tpu.memory_space<vmem>>, %arg3: memref<2x1x16xi32, #tpu.memory_space<vmem>>, %arg4: memref<1x1x1xf32, #tpu.memory_space<vmem>>, %arg5: memref<1x1x1xf32, #tpu.memory_space<vmem>>) attributes {dimension_semantics = [#tpu.dimension_semantics<parallel>, #tpu.dimension_semantics<parallel>], iteration_bounds = array<i64: 1, 1>, scalar_prefetch = 0 : i64, scratch_operands = 0 : i64, tpu.core_type = #tpu.core_type<tc>, window_params = [{transform_indices = @transform_0, window_bounds = array<i64: 2, 4, 16>}, {transform_indices = @transform_1, window_bounds = array<i64: 2, 1, 16>}, {transform_indices = @transform_2, window_bounds = array<i64: 1, 1, 1>}, {transform_indices = @transform_3, window_bounds = array<i64: 1, 1, 1>}]} {
    %c0 = arith.constant 0 : index
    %c0_0 = arith.constant 0 : index
    %c0_1 = arith.constant 0 : index
    %0 = vector.load %arg2[%c0, %c0_0, %c0_1] : memref<2x4x16xf32, #tpu.memory_space<vmem>>, vector<2x4x16xf32>
    %c0_2 = arith.constant 0 : index
    %c0_3 = arith.constant 0 : index
    %c0_4 = arith.constant 0 : index
    %1 = vector.load %arg3[%c0_2, %c0_3, %c0_4] : memref<2x1x16xi32, #tpu.memory_space<vmem>>, vector<2x1x16xi32>
    %cst = arith.constant dense<0xFF800000> : vector<2x16xf32>
    %2 = vector.multi_reduction <maximumf>, %0, %cst [1] : vector<2x4x16xf32> to vector<2x16xf32>
    %3 = vector.shape_cast %2 : vector<2x16xf32> to vector<2x1x16xf32>
    %4 = vector.broadcast %3 : vector<2x1x16xf32> to vector<2x4x16xf32>
    %5 = arith.subf %0, %4 : vector<2x4x16xf32>
    %6 = math.exp %5 : vector<2x4x16xf32>
    %cst_5 = arith.constant dense<0.000000e+00> : vector<2x16xf32>
    %7 = vector.multi_reduction <add>, %6, %cst_5 [1] : vector<2x4x16xf32> to vector<2x16xf32>
    %8 = vector.shape_cast %7 : vector<2x16xf32> to vector<2x1x16xf32>
    %9 = math.log %8 : vector<2x1x16xf32>
    %10 = tpu.iota {dimensions = array<i32: 1>} : vector<2x4x16xi32>
    %11 = vector.broadcast %1 : vector<2x1x16xi32> to vector<2x4x16xi32>
    %12 = arith.cmpi eq, %10, %11 : vector<2x4x16xi32>
    %cst_6 = arith.constant 0.000000e+00 : f32
    %13 = vector.broadcast %cst_6 : f32 to vector<2x4x16xf32>
    %14 = arith.select %12, %5, %13 : vector<2x4x16xi1>, vector<2x4x16xf32>
    %cst_7 = arith.constant dense<0.000000e+00> : vector<2x16xf32>
    %15 = vector.multi_reduction <add>, %14, %cst_7 [1] : vector<2x4x16xf32> to vector<2x16xf32>
    %16 = vector.shape_cast %15 : vector<2x16xf32> to vector<2x1x16xf32>
    %17 = arith.subf %9, %16 : vector<2x1x16xf32>
    %cst_8 = arith.constant dense<0.000000e+00> : vector<2x16xf32>
    %18 = vector.multi_reduction <add>, %5, %cst_8 [1] : vector<2x4x16xf32> to vector<2x16xf32>
    %19 = vector.shape_cast %18 : vector<2x16xf32> to vector<2x1x16xf32>
    %cst_9 = arith.constant 4.000000e+00 : f32
    %20 = vector.broadcast %cst_9 : f32 to vector<2x1x16xf32>
    %21 = arith.divf %19, %20 : vector<2x1x16xf32>
    %22 = arith.subf %9, %21 : vector<2x1x16xf32>
    %cst_10 = arith.constant 0.899999976 : f32
    %23 = vector.broadcast %cst_10 : f32 to vector<2x1x16xf32>
    %24 = arith.mulf %23, %17 : vector<2x1x16xf32>
    %cst_11 = arith.constant 1.000000e-01 : f32
    %25 = vector.broadcast %cst_11 : f32 to vector<2x1x16xf32>
    %26 = arith.mulf %25, %22 : vector<2x1x16xf32>
    %27 = arith.addf %24, %26 : vector<2x1x16xf32>
    %28 = vector.broadcast %3 : vector<2x1x16xf32> to vector<2x4x16xf32>
    %29 = arith.cmpf oeq, %0, %28 : vector<2x4x16xf32>
    %c4_i32 = arith.constant 4 : i32
    %30 = vector.broadcast %c4_i32 : i32 to vector<2x4x16xi32>
    %31 = arith.select %29, %10, %30 : vector<2x4x16xi1>, vector<2x4x16xi32>
    %cst_12 = arith.constant dense<2147483647> : vector<2x16xi32>
    %32 = vector.multi_reduction <minsi>, %31, %cst_12 [1] : vector<2x4x16xi32> to vector<2x16xi32>
    %33 = vector.shape_cast %32 : vector<2x16xi32> to vector<2x1x16xi32>
    %34 = arith.cmpi eq, %33, %1 : vector<2x1x16xi32>
    %35 = arith.extui %34 : vector<2x1x16xi1> to vector<2x1x16xi32>
    %36 = arith.sitofp %35 : vector<2x1x16xi32> to vector<2x1x16xf32>
    %37 = tpu.iota {dimensions = array<i32: 2>} : vector<2x1x16xi32>
    %c16_i32 = arith.constant 16 : i32
    %38 = arith.muli %arg1, %c16_i32 : i32
    %39 = vector.broadcast %38 : i32 to vector<2x1x16xi32>
    %40 = arith.addi %39, %37 : vector<2x1x16xi32>
    %c16_i32_13 = arith.constant 16 : i32
    %41 = vector.broadcast %c16_i32_13 : i32 to vector<2x1x16xi32>
    %42 = arith.cmpi slt, %40, %41 : vector<2x1x16xi32>
    %cst_14 = arith.constant 0.000000e+00 : f32
    %43 = vector.broadcast %cst_14 : f32 to vector<2x1x16xf32>
    %44 = arith.select %42, %27, %43 : vector<2x1x16xi1>, vector<2x1x16xf32>
    %cst_15 = arith.constant 0.000000e+00 : f32
    %45 = vector.broadcast %cst_15 : f32 to vector<2x1x16xf32>
    %46 = arith.select %42, %36, %45 : vector<2x1x16xi1>, vector<2x1x16xf32>
    %cst_16 = arith.constant dense<0.000000e+00> : vector<2x1xf32>
    %47 = vector.multi_reduction <add>, %44, %cst_16 [2] : vector<2x1x16xf32> to vector<2x1xf32>
    %48 = vector.shape_cast %47 : vector<2x1xf32> to vector<2x1x1xf32>
    %cst_17 = arith.constant dense<0.000000e+00> : vector<1x1xf32>
    %49 = vector.multi_reduction <add>, %48, %cst_17 [0] : vector<2x1x1xf32> to vector<1x1xf32>
    %50 = vector.shape_cast %49 : vector<1x1xf32> to vector<1x1x1xf32>
    %cst_18 = arith.constant dense<0.000000e+00> : vector<2x1xf32>
    %51 = vector.multi_reduction <add>, %46, %cst_18 [2] : vector<2x1x16xf32> to vector<2x1xf32>
    %52 = vector.shape_cast %51 : vector<2x1xf32> to vector<2x1x1xf32>
    %cst_19 = arith.constant dense<0.000000e+00> : vector<1x1xf32>
    %53 = vector.multi_reduction <add>, %52, %cst_19 [0] : vector<2x1x1xf32> to vector<1x1xf32>
    %54 = vector.shape_cast %53 : vector<1x1xf32> to vector<1x1x1xf32>
    %c0_20 = arith.constant 0 : index
    %c0_21 = arith.constant 0 : index
    %c0_22 = arith.constant 0 : index
    %55 = vector.load %arg4[%c0_20, %c0_21, %c0_22] : memref<1x1x1xf32, #tpu.memory_space<vmem>>, vector<1x1x1xf32>
    tpu.vector_store %arg4[%c0_20, %c0_21, %c0_22], %50 {strides = array<i32>} : memref<1x1x1xf32, #tpu.memory_space<vmem>>, vector<1x1x1xf32>,
    %c0_23 = arith.constant 0 : index
    %c0_24 = arith.constant 0 : index
    %c0_25 = arith.constant 0 : index
    %56 = vector.load %arg5[%c0_23, %c0_24, %c0_25] : memref<1x1x1xf32, #tpu.memory_space<vmem>>, vector<1x1x1xf32>
    tpu.vector_store %arg5[%c0_23, %c0_24, %c0_25], %54 {strides = array<i32>} : memref<1x1x1xf32, #tpu.memory_space<vmem>>, vector<1x1x1xf32>,
    return
  }
  func.func @transform_0(%arg0: i32, %arg1: i32) -> (i32, i32, i32) {
    %c0_i32 = arith.constant 0 : i32
    %c0_i32_0 = arith.constant 0 : i32
    return %arg0, %c0_i32, %arg1 : i32, i32, i32
  }
  func.func @transform_1(%arg0: i32, %arg1: i32) -> (i32, i32, i32) {
    %c0_i32 = arith.constant 0 : i32
    %c0_i32_0 = arith.constant 0 : i32
    return %arg0, %c0_i32, %arg1 : i32, i32, i32
  }
  func.func @transform_2(%arg0: i32, %arg1: i32) -> (i32, i32, i32) {
    %c1_i32 = arith.constant 1 : i32
    %0 = arith.muli %arg0, %c1_i32 : i32
    %1 = arith.addi %0, %arg1 : i32
    %c0_i32 = arith.constant 0 : i32
    %c0_i32_0 = arith.constant 0 : i32
    %c0_i32_1 = arith.constant 0 : i32
    return %1, %c0_i32, %c0_i32_0 : i32, i32, i32
  }
  func.func @transform_3(%arg0: i32, %arg1: i32) -> (i32, i32, i32) {
    %c1_i32 = arith.constant 1 : i32
    %0 = arith.muli %arg0, %c1_i32 : i32
    %1 = arith.addi %0, %arg1 : i32
    %c0_i32 = arith.constant 0 : i32
    %c0_i32_0 = arith.constant 0 : i32
    %c0_i32_1 = arith.constant 0 : i32
    return %1, %c0_i32, %c0_i32_0 : i32, i32, i32
  }
}

</mosaic_0001>

<bundles_post_ra>
// kernel: tpu_custom_call.1
= control target key start
LH: loop header
LB: loop body
LE: loop exit
PB: predicated region body
PF: predicated region fallthrough
CT: control target
= control target key end

     0   :  { %9 = vsyncpa [#allocation3], 0  ;;  %s414_s0 = inlined_call_operand.hbm [shape: f32[2,4,16], index: 0, kind: input, shape index: {}]   ;;  %s415_s1 = inlined_call_operand.hbm [shape: s32[2,1,16], index: 1, kind: input, shape index: {}]   ;;  %s416_s2 = inlined_call_operand.hbm [shape: f32[1,1,1], index: 2, kind: output, shape index: {0}]   ;;  %s417_s3 = inlined_call_operand.hbm [shape: f32[1,1,1], index: 3, kind: output, shape index: {1}]  }
   0x1   :  { %10 = vsyncpa [#allocation6], 0 }
   0x2   :  { %11 = vsyncpa [#allocation4], 0 }
   0x3   :  { %12 = vsyncpa [#allocation9], 0  ;;  %s348_s12 = smov [#allocation2]  }
   0x4   :  { %s18_s13 = sshll.u32 %s348_s12, 4  ;;  %s19_s13 = int_to_ptr.vmem [resolvable:$true] %s18_s13 }
   0x5   :  { %s268_s14 = scalar_lea.vmem %s19_s13, 128  ;;  %p273_p1 = scmp.lt.s32.totalorder %s19_s13, %s19_s13 }
   0x6   :  { %p269_p0 = scmp.ne.s32.totalorder %s19_s13, %s268_s14  ;;  %p274_p2 = scmp.lt.s32.totalorder %s268_s14, %s268_s14 }
   0x8   :  { %p275_p3 = por %p274_p2, %p273_p1 }
   0xa   :  { %p276_p4 = pnand %p275_p3, %p269_p0 }
   0xc   :  { %279 = shalt.err (!%p276_p4)
}
   0xd   :  { %s349_s15 = smov 64   ;;  %s350_s16 = smov 4  }
   0xe   :  { %24 = dma.hbm_to_vmem [thread:$0]  %s414_s0, 128, %s19_s13, [#allocation3], %s349_s15, %s349_s15, %s350_s16  }
   0xf   :  { %s351_s19 = smov [#allocation5]  }
  0x10   :  { %s30_s20 = sshll.u32 %s351_s19, 4  ;;  %s31_s20 = int_to_ptr.vmem [resolvable:$true] %s30_s20 }
  0x11   :  { %s288_s21 = scalar_lea.vmem %s31_s20, 32  ;;  %p293_p6 = scmp.lt.s32.totalorder %s31_s20, %s31_s20 }
  0x12   :  { %p289_p5 = scmp.ne.s32.totalorder %s31_s20, %s288_s21  ;;  %p294_p7 = scmp.lt.s32.totalorder %s288_s21, %s288_s21 }
  0x14   :  { %p295_p8 = por %p294_p7, %p293_p6 }
  0x16   :  { %p296_p9 = pnand %p295_p8, %p289_p5 }
  0x18   :  { %299 = shalt.err (!%p296_p9)
}
  0x19   :  { %s352_s22 = smov 16   ;;  %s353_s23 = smov 1  }
  0x1a   :  { %36 = dma.hbm_to_vmem [thread:$0]  %s415_s1, 32, %s31_s20, [#allocation6], %s352_s22, %s352_s22, %s353_s23  }
  0x1b   :  { %340 = dma.done.wait [#allocation3], 128  }
  0x1c   :  { %341 = vsyncadd [#allocation3], 4294967168 }
  0x1d   :  { %342 = dma.done.wait [#allocation6], 32  }
  0x1e   :  { %343 = vsyncadd [#allocation6], 4294967264  ;;  %vm49_vm0 = vcmask 125952   ;;  %v45_v0 = vld [vmem:[#allocation2] sm:$0xf]  ;;  %v88_v12 = vlaneseq  ;;  %vm191_vm11 = vcmask 122880  }
  0x1f   :  { %v46_v1 = vld [vmem:[#allocation2 + $0x4] sm:$0xf]  ;;  %v50_v2 = vsel %vm49_vm0, %v45_v0, -inf  ;;  %v47_v30 = vld [vmem:[#allocation5] sm:$0x1]  ;;  %v354_v43 = vmov 0.0  }
  0x20   :  { %v57_v3 = vsel %vm49_vm0, %v46_v1, -inf  ;;  %v51_v4 = vrot.slane %v50_v2, 4  ;;  %v89_v17 = vshrl.u32 %v88_v12, 7  ;;  %v48_v32 = vld [vmem:[#allocation5 + $0x1] sm:$0x1]  ;;  %v387_v37 = vand.u32 127, %v88_v12 }
  0x21   :  { %v58_v5 = vrot.slane %v57_v3, 4  ;;  %vm183_vm15 = vcmask 130048   ;;  %s355_s0 = smov [#allocation8]  }
  0x22   :  { %v52_v6 = vmax.f32 %v50_v2, %v51_v4  ;;  %v92_v28 = vsub.s32 0, %v89_v17  ;;  %vm178_vm9 = vcmp.lt.s32.totalorder %v387_v37, 16  ;;  %s227_s1 = sshll.u32 %s355_s0, 4  ;;  %s228_s1 = int_to_ptr.vmem [resolvable:$true] %s227_s1 }
  0x23   :  { %v59_v7 = vmax.f32 %v57_v3, %v58_v5  ;;  %s300_s26 = scalar_lea.vmem %s228_s1, 16  ;;  %s304_s27 = scalar_lea.vmem %s228_s1, 32 }
  0x24   :  { %v53_v8 = vrot.slane %v52_v6, 2  ;;  %v93_v35 = vrot.slane %v47_v30, %v92_v28  ;;  %v97_v39 = vrot.slane %v48_v32, %v92_v28  ;;  %p301_p10 = scmp.ne.s32.totalorder %s228_s1, %s300_s26  ;;  %p305_p11 = scmp.lt.s32.totalorder %s228_s1, %s228_s1 }
  0x25   :  { %v60_v9 = vrot.slane %v59_v7, 2  ;;  %p306_p12 = scmp.lt.s32.totalorder %s304_s27, %s300_s26 }
  0x26   :  { %v54_v10 = vmax.f32 %v52_v6, %v53_v8  ;;  %vm98_vm8 = vcmp.eq.s32.totalorder %v89_v17, %v93_v35  ;;  %vm99_vm12 = vcmp.eq.s32.totalorder %v89_v17, %v97_v39 }
  0x27   :  { %v61_v11 = vmax.f32 %v59_v7, %v60_v9  ;;  %p307_p13 = por %p306_p12, %p305_p11 }
  0x28   :  { %v55_v13 = vrot.slane %v54_v10, 1 }
  0x29   :  { %v62_v14 = vrot.slane %v61_v11, 1  ;;  %p308_p0 = pnand %p307_p13, %p301_p10 }
  0x2a   :  { %v56_v15 = vmax.f32 %v54_v10, %v55_v13 }
  0x2b   :  { %v63_v16 = vmax.f32 %v61_v11, %v62_v14 }
  0x2c   :  { %vm143_vm1 = vcmp.eq.f32.partialorder %v45_v0, %v56_v15  ;;  %v64_v18 = vsub.f32 %v45_v0, %v56_v15 }
  0x2d   :  { %v65_v19 = vsub.f32 %v46_v1, %v63_v16  ;;  %vm144_vm2 = vcmp.eq.f32.partialorder %v46_v1, %v63_v16  ;;  %v145_v20 = vsel %vm143_vm1, %v89_v17, 4  ;;  %vm202_vm1 = vcmask 0  }
  0x2e   :  { %v146_v21 = vsel %vm144_vm2, %v89_v17, 4  ;;  %v147_v22 = vsel %vm49_vm0, %v145_v20, 2147483647  ;;  %v66_v23 = vmul.f32 1.442695, %v64_v18  ;;  %v118_v46 = vsel %vm49_vm0, %v64_v18, 0.0 }
  0x2f   :  { %v148_v24 = vrot.slane %v147_v22, 4  ;;  %v68_v25 = vmul.f32 1.442695, %v65_v19  ;;  %v157_v26 = vsel %vm49_vm0, %v146_v21, 2147483647  ;;  %v100_v49 = vsel %vm98_vm8, %v64_v18, 0.0 }
  0x30   :  { %252 = vpow2.f32 %v66_v23  ;;  %v158_v27 = vrot.slane %v157_v26, 4  ;;  %v125_v50 = vsel %vm49_vm0, %v65_v19, 0.0  ;;  %v101_v53 = vsel %vm99_vm12, %v65_v19, 0.0 }
  0x31   :  { %vm149_vm3 = vcmp.lt.s32.totalorder %v147_v22, %v148_v24  ;;  %254 = vpow2.f32 %v68_v25  ;;  %v119_v58 = vrot.slane %v118_v46, 4  ;;  %v102_v60 = vsel %vm49_vm0, %v100_v49, 0.0 }
  0x32   :  { %v150_v29 = vsel %vm149_vm3, %v147_v22, %v148_v24  ;;  %vm159_vm4 = vcmp.lt.s32.totalorder %v157_v26, %v158_v27  ;;  %v126_v63 = vrot.slane %v125_v50, 4  ;;  %v109_v0 = vsel %vm49_vm0, %v101_v53, 0.0 }
  0x33   :  { %v151_v31 = vrot.slane %v150_v29, 2  ;;  %v160_v33 = vsel %vm159_vm4, %v157_v26, %v158_v27  ;;  %v103_v3 = vrot.slane %v102_v60, 4  ;;  %v120_v5 = vadd.f32 %v119_v58, %v118_v46 }
  0x34   :  { %v161_v34 = vrot.slane %v160_v33, 2  ;;  %v110_v6 = vrot.slane %v109_v0, 4  ;;  %v127_v8 = vadd.f32 %v126_v63, %v125_v50 }
  0x35   :  { %vm152_vm5 = vcmp.lt.s32.totalorder %v150_v29, %v151_v31  ;;  %v104_v11 = vadd.f32 %v103_v3, %v102_v60  ;;  %v121_v13 = vrot.slane %v120_v5, 2 }
  0x36   :  { %v153_v36 = vsel %vm152_vm5, %v150_v29, %v151_v31  ;;  %vm162_vm6 = vcmp.lt.s32.totalorder %v160_v33, %v161_v34  ;;  %v111_v14 = vadd.f32 %v110_v6, %v109_v0  ;;  %v128_v16 = vrot.slane %v127_v8, 2 }
  0x37   :  { %v154_v38 = vrot.slane %v153_v36, 1  ;;  %v163_v40 = vsel %vm162_vm6, %v160_v33, %v161_v34  ;;  %v105_v19 = vrot.slane %v104_v11, 2  ;;  %v122_v20 = vadd.f32 %v121_v13, %v120_v5 }
  0x38   :  { %v164_v41 = vrot.slane %v163_v40, 1  ;;  %v112_v21 = vrot.slane %v111_v14, 2  ;;  %v129_v22 = vadd.f32 %v128_v16, %v127_v8 }
  0x39   :  { %vm155_vm7 = vcmp.lt.s32.totalorder %v153_v36, %v154_v38  ;;  %v106_v23 = vadd.f32 %v105_v19, %v104_v11  ;;  %v123_v24 = vrot.slane %v122_v20, 1 }
  0x3a   :  { %v156_v42 = vsel %vm155_vm7, %v153_v36, %v154_v38  ;;  %vm165_vm13 = vcmp.lt.s32.totalorder %v163_v40, %v164_v41  ;;  %v113_v25 = vadd.f32 %v112_v21, %v111_v14  ;;  %v130_v26 = vrot.slane %v129_v22, 1 }
  0x3b   :  { %vm167_vm10 = vcmp.eq.s32.totalorder %v156_v42, %v47_v30  ;;  %v166_v45 = vsel %vm165_vm13, %v163_v40, %v164_v41  ;;  %v107_v27 = vrot.slane %v106_v23, 1  ;;  %v124_v28 = vadd.f32 %v123_v24, %v122_v20 }
  0x3c   :  { %v241_v44 = vsel %vm167_vm10, 1.0, %v354_v43  ;;  %vm168_vm14 = vcmp.eq.s32.totalorder %v166_v45, %v48_v32  ;;  %v114_v29 = vrot.slane %v113_v25, 1  ;;  %v131_v30 = vadd.f32 %v130_v26, %v129_v22 }
  0x3d   :  { %v253_v47 = vpop.eup %252  ;;  %v181_v48 = vsel %vm178_vm9, %v241_v44, 0.0  ;;  %v242_v54 = vsel %vm168_vm14, 1.0, %v354_v43  ;;  %v108_v31 = vadd.f32 %v107_v27, %v106_v23  ;;  %v133_v32 = vmul.f32 0.25, %v124_v28 }
  0x3e   :  { %v255_v51 = vpop.eup %254  ;;  %v192_v52 = vsel %vm191_vm11, %v181_v48, 0.0  ;;  %v70_v55 = vsel %vm49_vm0, %v253_v47, 0.0  ;;  %v182_v56 = vsel %vm178_vm9, %v242_v54, 0.0  ;;  %v115_v34 = vadd.f32 %v114_v29, %v113_v25 }
  0x3f   :  { %193 = vadd.xlane.f32.xlu0 %v192_v52  ;;  %v71_v57 = vrot.slane %v70_v55, 4  ;;  %v77_v59 = vsel %vm49_vm0, %v255_v51, 0.0  ;;  %v195_v61 = vsel %vm191_vm11, %v182_v56, 0.0  ;;  %v134_v35 = vmul.f32 0.25, %v131_v30 }
  0x40   :  { %v78_v62 = vrot.slane %v77_v59, 4  ;;  %vm198_vm0 = vcmask 1040384  }
  0x41   :  { %v72_v1 = vadd.f32 %v71_v57, %v70_v55 }
  0x42   :  { %v79_v2 = vadd.f32 %v78_v62, %v77_v59 }
  0x43   :  { %196 = vadd.xlane.f32.xlu0 %v195_v61  ;;  %v73_v4 = vrot.slane %v72_v1, 2 }
  0x44   :  { %v80_v7 = vrot.slane %v79_v2, 2 }
  0x45   :  { %v74_v9 = vadd.f32 %v73_v4, %v72_v1 }
  0x46   :  { %v81_v10 = vadd.f32 %v80_v7, %v79_v2 }
  0x47   :  { %v75_v12 = vrot.slane %v74_v9, 1 }
  0x48   :  { %v82_v15 = vrot.slane %v81_v10, 1 }
  0x49   :  { %v76_v17 = vadd.f32 %v75_v12, %v74_v9 }
  0x4a   :  { %v83_v18 = vadd.f32 %v82_v15, %v81_v10 }
  0x4b   :  { %256 = vlog2.f32 %v76_v17 }
  0x4c   :  { %258 = vlog2.f32 %v83_v18 }
  0x58   :  { %v257_v33 = vpop.eup %256 }
  0x59   :  { %v259_v36 = vpop.eup %258  ;;  %v85_v38 = vmul.f32 0.6931472, %v257_v33 }
  0x5a   :  { %v87_v39 = vmul.f32 0.6931472, %v259_v36 }
  0x5b   :  { %v116_v40 = vsub.f32 %v85_v38, %v108_v31  ;;  %v135_v41 = vsub.f32 %v85_v38, %v133_v32 }
  0x5c   :  { %v117_v42 = vsub.f32 %v87_v39, %v115_v34  ;;  %v136_v43 = vsub.f32 %v87_v39, %v134_v35 }
  0x5d   :  { %v137_v44 = vmul.f32 0.9, %v116_v40  ;;  %v139_v45 = vmul.f32 0.1, %v135_v41 }
  0x5e   :  { %v138_v46 = vmul.f32 0.9, %v117_v42  ;;  %v140_v47 = vmul.f32 0.1, %v136_v43 }
  0x5f   :  { %v141_v48 = vadd.f32 %v139_v45, %v137_v44 }
  0x60   :  { %v142_v49 = vadd.f32 %v140_v47, %v138_v46 }
  0x61   :  { %v179_v50 = vsel %vm178_vm9, %v141_v48, 0.0 }
  0x62   :  { %v184_v51 = vsel %vm183_vm15, %v179_v50, 0.0  ;;  %v180_v52 = vsel %vm178_vm9, %v142_v49, 0.0 }
  0x63   :  { %185 = vadd.xlane.f32.xlu1 %v184_v51  ;;  %v187_v53 = vsel %vm183_vm15, %v180_v52, 0.0 }
  0x67   :  { %188 = vadd.xlane.f32.xlu1 %v187_v53 }
  0xc8   :  { %v194_v54 = vpop.xlane.xlu0 %193 }
  0xc9   :  { %v199_v55 = vsel %vm198_vm0, %v194_v54, 0.0 }
  0xcc   :  { %v197_v56 = vpop.xlane.xlu0 %196 }
  0xcd   :  { %v200_v57 = vsel %vm198_vm0, %v197_v56, 0.0 }
  0xce   :  { %v201_v58 = vadd.f32 %v200_v57, %v199_v55 }
  0xd0   :  { %204 = vst.msk [vmem:[#allocation8] sm:$0x1] %vm202_vm1, %v201_v58 }
  0xd1   :  { %311 = shalt.err (!%p308_p0)
}
  0xd2   :  { %230 = dma.vmem_to_hbm [thread:$0]  %s228_s1, 16, %s417_s3, [#allocation9]  }
  0xd3   :  { %s356_s30 = smov [#allocation7]  }
  0xd4   :  { %s214_s4 = sshll.u32 %s356_s30, 4  ;;  %s215_s4 = int_to_ptr.vmem [resolvable:$true] %s214_s4 }
  0xd5   :  { %s320_s5 = scalar_lea.vmem %s215_s4, 16  ;;  %s324_s6 = scalar_lea.vmem %s215_s4, 32 }
  0xd6   :  { %p321_p1 = scmp.ne.s32.totalorder %s215_s4, %s320_s5  ;;  %p325_p2 = scmp.lt.s32.totalorder %s215_s4, %s215_s4 }
  0xd7   :  { %p326_p3 = scmp.lt.s32.totalorder %s324_s6, %s320_s5 }
  0xd9   :  { %p327_p4 = por %p326_p3, %p325_p2 }
  0xdb   :  { %p328_p5 = pnand %p327_p4, %p321_p1 }
  0xec   :  { %v186_v37 = vpop.xlane.xlu1 %185 }
  0xf0   :  { %v189_v59 = vpop.xlane.xlu1 %188 }
  0xf1   :  { %v190_v60 = vadd.f32 %v189_v59, %v186_v37 }
  0xf3   :  { %203 = vst.msk [vmem:[#allocation7] sm:$0x1] %vm202_vm1, %v190_v60 }
  0xf4   :  { %331 = shalt.err (!%p328_p5)
}
  0xf5   :  { %217 = dma.vmem_to_hbm [thread:$0]  %s215_s4, 16, %s416_s2, [#allocation4]  }
  0xf6   :  { %344 = dma.done.wait [#allocation4], 16  }
  0xf7   :  { %345 = vsyncadd [#allocation4], 4294967280 }
  0xf8   :  { %346 = dma.done.wait [#allocation9], 16  }
  0xf9   :  { %347 = vsyncadd [#allocation9], 4294967280 }
  0xfa   :  { %237 = vsyncpa [#allocation3], 1 }
  0xfb   :  { %238 = vsyncpa [#allocation6], 1 }
  0xfc   :  { %239 = vsyncpa [#allocation4], 1 }
  0xfd   :  { %240 = vsyncpa [#allocation9], 1 }

</bundles_post_ra>
